<compile_context>
chip_gen: v5e
topology: v5e:2x2
jax: 0.10.0
libtpu: 0.0.40
codegen_flags: <defaults>
</compile_context>

<pallas_src>
import jax
import jax.numpy as jnp
from jax.experimental import pallas as pl
from jax.experimental.pallas import tpu as pltpu


def _wrapped_linear_kernel(x_ref, w_ref, b_ref, o_ref):
    """One (M-tile, N-tile) block of the wrapped module: y = x @ W + b.

    Grid axis 2 is the K reduction ("arbitrary", innermost).  The f32 output
    tile itself is the accumulator (resident across K): zeroed at k == 0,
    bias added at the last K step.  Operands are cast to bf16 in-kernel, right
    before the MXU dot.
    """
    k = pl.program_id(2)

    @pl.when(k == 0)
    def _init():
        o_ref[...] = jnp.zeros_like(o_ref)

    o_ref[...] += jnp.dot(
        x_ref[...].astype(jnp.bfloat16),
        w_ref[...].astype(jnp.bfloat16),
        preferred_element_type=jnp.float32,
    )

    @pl.when(k == pl.num_programs(2) - 1)
    def _finalize():
        o_ref[...] += b_ref[...]  # (1, tn) broadcasts over (tm, tn), f32 epilogue


def _pick_tile(dim, cap=512):
    """Largest lane/MXU-friendly tile <= cap that evenly divides `dim`.

    Small dims collapse to a single block (full-array block shapes are always
    legal, and for the test-sized problem one big block beats per-step grid
    overhead by ~10x).
    """
    if dim <= cap:
        return dim
    for t in (cap, 256, 128):
        if dim % t == 0:
            return t
    return dim  # ragged dim: fall back to one full block along this axis


def model_wrapper_forward(x, w, b, *, tm=None, tn=None, tk=None):
    """Pallas equivalent of ModelWrapper(Linear).forward(x) == x @ W + b.

    x: [M, K] float32   w: [K, N] float32 (PyTorch weight transposed)
    b: [N]    float32   returns [M, N] float32.

    Grid axes: (M "parallel" = the data-parallel scatter/gather dim,
                N "parallel", K "arbitrary" reduction).
    """
    M, K = x.shape
    K2, N = w.shape
    assert K == K2, "weight inner dim must match x features"

    tm = _pick_tile(M) if tm is None else min(tm, M)
    tn = _pick_tile(N) if tn is None else min(tn, N)
    tk = _pick_tile(K) if tk is None else min(tk, K)
    assert M % tm == 0 and N % tn == 0 and K % tk == 0, "dims must tile evenly"

    b2 = b.reshape(1, N).astype(jnp.float32)
    grid = (M // tm, N // tn, K // tk)

    cost = pl.CostEstimate(
        flops=2 * M * N * K,
        transcendentals=0,
        bytes_accessed=(x.size * 4 + w.size * 4 + b2.size * 4 + M * N * 4),
    )

    return pl.pallas_call(
        _wrapped_linear_kernel,
        out_shape=jax.ShapeDtypeStruct((M, N), jnp.float32),
        grid_spec=pltpu.PrefetchScalarGridSpec(
            num_scalar_prefetch=0,
            grid=grid,
            in_specs=[
                # scatter: M-tile i of the batch.
                pl.BlockSpec((tm, tk), lambda i, j, k: (i, k)),
                # replicate: every M-tile sees the same (k, j) weight tile.
                pl.BlockSpec((tk, tn), lambda i, j, k: (k, j)),
                pl.BlockSpec((1, tn), lambda i, j, k: (0, j)),
            ],
            # gather: M-tile i writes rows [i*tm, (i+1)*tm) of the output.
            # Same block for all k -> the f32 output tile is the accumulator.
            out_specs=pl.BlockSpec((tm, tn), lambda i, j, k: (i, j)),
        ),
        compiler_params=pltpu.CompilerParams(
            # M / N tiles independent (shardable across TCs); K is the reduction.
            dimension_semantics=("parallel", "parallel", "arbitrary"),
        ),
        cost_estimate=cost,
    )(x, w, b2)


if __name__ == "__main__":
    # Deterministic setup; small, lane-friendly shapes (multiples of 8/128).
    # With these sizes the grid collapses to a single block per the perf notes.
    B, D_IN, D_OUT = 128, 256, 256
    key = jax.random.PRNGKey(0)
    kx, kw, kb = jax.random.split(key, 3)

    x = jax.random.normal(kx, (B, D_IN), dtype=jnp.float32)
    # Deterministic "module" parameters (PyTorch Linear(D_IN, D_OUT) equivalent).
    w_torch = jax.random.normal(kw, (D_OUT, D_IN), dtype=jnp.float32) * 0.05  # [out, in]
    b_torch = jax.random.normal(kb, (D_OUT,), dtype=jnp.float32) * 0.1

    w = w_torch.T  # [K, N] so the kernel computes x @ W

    out = model_wrapper_forward(x, w, b_torch)
    out = jax.block_until_ready(out)

    # Reference: ModelWrapper.forward == module(x); same bf16-in / f32-acc path.
    ref = (
        jnp.dot(
            x.astype(jnp.bfloat16),
            w.astype(jnp.bfloat16),
            preferred_element_type=jnp.float32,
        )
        + b_torch
    )
    assert out.shape == (B, D_OUT)
    assert jnp.allclose(out, ref, atol=1e-2, rtol=1e-2)

    # TODO(synk): true multi-chip scatter/replicate/parallel_apply/gather
    # (nn.DataParallel across real devices) would use make_async_remote_copy;
    # here the data-parallel axis is the "parallel" M grid dimension on one chip.
    print("KERNEL_OK")
</pallas_src>

<mosaic_0001>
module attributes {stable_mosaic.version = 11 : i64} {
  func.func @_wrapped_linear_kernel(%arg0: i32, %arg1: i32, %arg2: i32, %arg3: memref<128x256xf32, #tpu.memory_space<vmem>>, %arg4: memref<256x256xf32, #tpu.memory_space<vmem>>, %arg5: memref<1x256xf32, #tpu.memory_space<vmem>>, %arg6: memref<128x256xf32, #tpu.memory_space<vmem>>) attributes {dimension_semantics = [#tpu.dimension_semantics<parallel>, #tpu.dimension_semantics<parallel>, #tpu.dimension_semantics<arbitrary>], iteration_bounds = array<i64: 1, 1, 1>, scalar_prefetch = 0 : i64, scratch_operands = 0 : i64, tpu.core_type = #tpu.core_type<tc>, window_params = [{transform_indices = @transform_0, window_bounds = array<i64: 128, 256>}, {transform_indices = @transform_1, window_bounds = array<i64: 256, 256>}, {transform_indices = @transform_2, window_bounds = array<i64: 1, 256>}, {transform_indices = @transform_3, window_bounds = array<i64: 128, 256>}]} {
    %c0_i32 = arith.constant 0 : i32
    %0 = arith.cmpi eq, %arg2, %c0_i32 : i32
    %1 = arith.extui %0 : i1 to i32
    %c0_i32_0 = arith.constant 0 : i32
    %2 = arith.cmpi ne, %1, %c0_i32_0 : i32
    scf.if %2 {
      %cst_10 = arith.constant 0.000000e+00 : f32
      %14 = vector.broadcast %cst_10 : f32 to vector<128x256xf32>
      %c0_11 = arith.constant 0 : index
      %c0_12 = arith.constant 0 : index
      %15 = vector.load %arg6[%c0_11, %c0_12] : memref<128x256xf32, #tpu.memory_space<vmem>>, vector<128x256xf32>
      tpu.vector_store %arg6[%c0_11, %c0_12], %14 {strides = array<i32>} : memref<128x256xf32, #tpu.memory_space<vmem>>, vector<128x256xf32>,
    } else {
    }
    %c0 = arith.constant 0 : index
    %c0_1 = arith.constant 0 : index
    %3 = vector.load %arg6[%c0, %c0_1] : memref<128x256xf32, #tpu.memory_space<vmem>>, vector<128x256xf32>
    %c0_2 = arith.constant 0 : index
    %c0_3 = arith.constant 0 : index
    %4 = vector.load %arg3[%c0_2, %c0_3] : memref<128x256xf32, #tpu.memory_space<vmem>>, vector<128x256xf32>
    %5 = arith.truncf %4 : vector<128x256xf32> to vector<128x256xbf16>
    %c0_4 = arith.constant 0 : index
    %c0_5 = arith.constant 0 : index
    %6 = vector.load %arg4[%c0_4, %c0_5] : memref<256x256xf32, #tpu.memory_space<vmem>>, vector<256x256xf32>
    %7 = arith.truncf %6 : vector<256x256xf32> to vector<256x256xbf16>
    %cst = arith.constant dense<0.000000e+00> : vector<128x256xf32>
    %8 = tpu.matmul %5, %7, %cst {dimension_numbers = #tpu.dot_dimension_numbers<[1], [0], [0], [1], [0, 0, 1, 1], [], []>} : vector<128x256xbf16>, vector<256x256xbf16>, vector<128x256xf32> -> vector<128x256xf32>
    %9 = arith.addf %3, %8 : vector<128x256xf32>
    %c0_6 = arith.constant 0 : index
    %c0_7 = arith.constant 0 : index
    %10 = vector.load %arg6[%c0_6, %c0_7] : memref<128x256xf32, #tpu.memory_space<vmem>>, vector<128x256xf32>
    tpu.vector_store %arg6[%c0_6, %c0_7], %9 {strides = array<i32>} : memref<128x256xf32, #tpu.memory_space<vmem>>, vector<128x256xf32>,
    %c0_i32_8 = arith.constant 0 : i32
    %11 = arith.cmpi eq, %arg2, %c0_i32_8 : i32
    %12 = arith.extui %11 : i1 to i32
    %c0_i32_9 = arith.constant 0 : i32
    %13 = arith.cmpi ne, %12, %c0_i32_9 : i32
    scf.if %13 {
      %c0_10 = arith.constant 0 : index
      %c0_11 = arith.constant 0 : index
      %14 = vector.load %arg6[%c0_10, %c0_11] : memref<128x256xf32, #tpu.memory_space<vmem>>, vector<128x256xf32>
      %c0_12 = arith.constant 0 : index
      %c0_13 = arith.constant 0 : index
      %15 = vector.load %arg5[%c0_12, %c0_13] : memref<1x256xf32, #tpu.memory_space<vmem>>, vector<1x256xf32>
      %16 = vector.broadcast %15 : vector<1x256xf32> to vector<128x256xf32>
      %17 = arith.addf %14, %16 : vector<128x256xf32>
      %c0_14 = arith.constant 0 : index
      %c0_15 = arith.constant 0 : index
      %18 = vector.load %arg6[%c0_14, %c0_15] : memref<128x256xf32, #tpu.memory_space<vmem>>, vector<128x256xf32>
      tpu.vector_store %arg6[%c0_14, %c0_15], %17 {strides = array<i32>} : memref<128x256xf32, #tpu.memory_space<vmem>>, vector<128x256xf32>,
    } else {
    }
    return
  }
  func.func @transform_0(%arg0: i32, %arg1: i32, %arg2: i32) -> (i32, i32) {
    %c0_i32 = arith.constant 0 : i32
    return %arg0, %arg2 : i32, i32
  }
  func.func @transform_1(%arg0: i32, %arg1: i32, %arg2: i32) -> (i32, i32) {
    %c0_i32 = arith.constant 0 : i32
    return %arg2, %arg1 : i32, i32
  }
  func.func @transform_2(%arg0: i32, %arg1: i32, %arg2: i32) -> (i32, i32) {
    %c0_i32 = arith.constant 0 : i32
    %c0_i32_0 = arith.constant 0 : i32
    return %c0_i32, %arg1 : i32, i32
  }
  func.func @transform_3(%arg0: i32, %arg1: i32, %arg2: i32) -> (i32, i32) {
    %c0_i32 = arith.constant 0 : i32
    return %arg0, %arg1 : i32, i32
  }
}

</mosaic_0001>

<bundles_post_ra>
// kernel: tpu_custom_call.1
= control target key start
LH: loop header
LB: loop body
LE: loop exit
PB: predicated region body
PF: predicated region fallthrough
CT: control target
= control target key end

     0   :  { %8 = vsyncpa [#allocation3], 0  ;;  %s849_s0 = inlined_call_operand.hbm [shape: f32[128,256], index: 0, kind: input, shape index: {}]   ;;  %s850_s1 = inlined_call_operand.hbm [shape: f32[256,256], index: 1, kind: input, shape index: {}]   ;;  %s851_s2 = inlined_call_operand.hbm [shape: f32[1,256], index: 2, kind: input, shape index: {}]   ;;  %s852_s3 = inlined_call_operand.hbm [shape: f32[128,256], index: 3, kind: output, shape index: {}]  }
   0x1   :  { %9 = vsyncpa [#allocation6], 0 }
   0x2   :  { %10 = vsyncpa [#allocation4], 0  ;;  %s28_s14 = sshll.u32 %s850_s1, 4  ;;  %s766_s15 = smov [#allocation5]   ;;  %s29_s14 = int_to_ptr.hbm [resolvable:$true] %s28_s14 }
   0x3   :  { %s30_s16 = sshll.u32 %s766_s15, 4  ;;  %s15_s19 = sshll.u32 %s849_s0, 4  ;;  %s31_s16 = int_to_ptr.vmem [resolvable:$true] %s30_s16  ;;  %s16_s19 = int_to_ptr.hbm [resolvable:$true] %s15_s19 }
   0x4   :  { %s767_s20 = smov 256   ;;  %s768_s21 = smov 16  }
   0x5   :  { %36 = dma.hbm_to_vmem [thread:$0]  %s29_s14, 8192, %s31_s16, [#allocation6], %s767_s20, %s767_s20, %s768_s21  }
   0x6   :  { %s769_s22 = smov [#allocation2]   ;;  %s42_s1 = sshll.u32 %s851_s2, 4  ;;  %s43_s1 = int_to_ptr.hbm [resolvable:$true] %s42_s1 }
   0x7   :  { %s17_s23 = sshll.u32 %s769_s22, 4  ;;  %s770_s0 = smov [#allocation7]   ;;  %s18_s23 = int_to_ptr.vmem [resolvable:$true] %s17_s23 }
   0x8   :  { %23 = dma.hbm_to_vmem [thread:$0]  %s16_s19, 4096, %s18_s23, [#allocation3], %s767_s20, %s767_s20, %s768_s21  }
   0x9   :  { %s44_s26 = sshll.u32 %s770_s0, 4  ;;  %s45_s26 = int_to_ptr.vmem [resolvable:$true] %s44_s26 }
   0xa   :  { %47 = dma.hbm_to_vmem [thread:$0]  %s43_s1, 32, %s45_s26, [#allocation6]  }
   0xb   :  { %760 = dma.done.wait [#allocation3], 4096  }
   0xc   :  { %761 = vsyncadd [#allocation3], 4294963200 }
   0xd   :  { %762 = dma.done.wait [#allocation6], 8224  }
   0xe   :  { %763 = vsyncadd [#allocation6], 4294959072  ;;  %v204_v0 = vld [vmem:[#allocation5 + $0xe0] sm:$0xff]  ;;  %v206_v1 = vld [vmem:[#allocation5 + $0xf0] sm:$0xff]  ;;  %s771_s2 = smov [#allocation8]   ;;  %s643_s30 = sshll.u32 %s852_s3, 4  ;;  %s644_s30 = int_to_ptr.hbm [resolvable:$true] %s643_s30 }
   0xf   :  { %v236_v2 = vld [vmem:[#allocation5 + $0x1e0] sm:$0xff]  ;;  %v254_v3 = vpack.c.bf16 %v206_v1, %v204_v0  ;;  %v238_v4 = vld [vmem:[#allocation5 + $0x1f0] sm:$0xff]  ;;  %v205_v5 = vld [vmem:[#allocation5 + $0xe8] sm:$0xff]  ;;  %s641_s27 = sshll.u32 %s771_s2, 4  ;;  %s642_s27 = int_to_ptr.vmem [resolvable:$true] %s641_s27 }
  0x10   :  { %v207_v6 = vld [vmem:[#allocation5 + $0xf8] sm:$0xff]  ;;  %v270_v7 = vpack.c.bf16 %v238_v4, %v236_v2  ;;  %v237_v9 = vld [vmem:[#allocation5 + $0x1e8] sm:$0xff]  ;;  %v200_v11 = vld [vmem:[#allocation5 + $0xc0] sm:$0xff] }
  0x11   :  { %v255_v8 = vpack.c.bf16 %v207_v6, %v205_v5  ;;  %v239_v10 = vld [vmem:[#allocation5 + $0x1f8] sm:$0xff]  ;;  %272 = vmatpush.bf16.msra.mxu0 %v254_v3  ;;  %v202_v13 = vld [vmem:[#allocation5 + $0xd0] sm:$0xff]  ;;  %v232_v14 = vld [vmem:[#allocation5 + $0x1c0] sm:$0xff] }
  0x12   :  { %v271_v12 = vpack.c.bf16 %v239_v10, %v237_v9  ;;  %v234_v15 = vld [vmem:[#allocation5 + $0x1d0] sm:$0xff]  ;;  %321 = vmatpush.bf16.msra.mxu1 %v270_v7  ;;  %v252_v16 = vpack.c.bf16 %v202_v13, %v200_v11  ;;  %v201_v18 = vld [vmem:[#allocation5 + $0xc8] sm:$0xff]  ;;  %v203_v19 = vld [vmem:[#allocation5 + $0xd8] sm:$0xff] }
  0x13   :  { %370 = vmatpush.bf16.msra.mxu2 %v255_v8  ;;  %v268_v17 = vpack.c.bf16 %v234_v15, %v232_v14  ;;  %v233_v20 = vld [vmem:[#allocation5 + $0x1c8] sm:$0xff]  ;;  %v253_v21 = vpack.c.bf16 %v203_v19, %v201_v18  ;;  %v235_v22 = vld [vmem:[#allocation5 + $0x1d8] sm:$0xff]  ;;  %v196_v23 = vld [vmem:[#allocation5 + $0xa0] sm:$0xff] }
  0x14   :  { %419 = vmatpush.bf16.msra.mxu3 %v271_v12  ;;  %v198_v24 = vld [vmem:[#allocation5 + $0xb0] sm:$0xff]  ;;  %v269_v25 = vpack.c.bf16 %v235_v22, %v233_v20  ;;  %v228_v26 = vld [vmem:[#allocation5 + $0x1a0] sm:$0xff]  ;;  %v197_v28 = vld [vmem:[#allocation5 + $0xa8] sm:$0xff] }
  0x15   :  { %v230_v27 = vld [vmem:[#allocation5 + $0x1b0] sm:$0xff]  ;;  %273 = vmatpush.bf16.msra.mxu0 %v252_v16  ;;  %v250_v29 = vpack.c.bf16 %v198_v24, %v196_v23  ;;  %v199_v30 = vld [vmem:[#allocation5 + $0xb8] sm:$0xff]  ;;  %v229_v31 = vld [vmem:[#allocation5 + $0x1a8] sm:$0xff] }
  0x16   :  { %v231_v32 = vld [vmem:[#allocation5 + $0x1b8] sm:$0xff]  ;;  %322 = vmatpush.bf16.msra.mxu1 %v268_v17  ;;  %v266_v33 = vpack.c.bf16 %v230_v27, %v228_v26  ;;  %v251_v34 = vpack.c.bf16 %v199_v30, %v197_v28  ;;  %v192_v35 = vld [vmem:[#allocation5 + $0x80] sm:$0xff]  ;;  %v194_v36 = vld [vmem:[#allocation5 + $0x90] sm:$0xff] }
  0x17   :  { %371 = vmatpush.bf16.msra.mxu2 %v253_v21  ;;  %v224_v37 = vld [vmem:[#allocation5 + $0x180] sm:$0xff]  ;;  %v267_v38 = vpack.c.bf16 %v231_v32, %v229_v31  ;;  %v226_v39 = vld [vmem:[#allocation5 + $0x190] sm:$0xff]  ;;  %v193_v40 = vld [vmem:[#allocation5 + $0x88] sm:$0xff]  ;;  %v248_v44 = vpack.c.bf16 %v194_v36, %v192_v35 }
  0x18   :  { %420 = vmatpush.bf16.msra.mxu3 %v269_v25  ;;  %v195_v41 = vld [vmem:[#allocation5 + $0x98] sm:$0xff]  ;;  %v225_v42 = vld [vmem:[#allocation5 + $0x188] sm:$0xff]  ;;  %v264_v45 = vpack.c.bf16 %v226_v39, %v224_v37  ;;  %v188_v47 = vld [vmem:[#allocation5 + $0x60] sm:$0xff] }
  0x19   :  { %v227_v43 = vld [vmem:[#allocation5 + $0x198] sm:$0xff]  ;;  %274 = vmatpush.bf16.msra.mxu0 %v250_v29  ;;  %v249_v46 = vpack.c.bf16 %v195_v41, %v193_v40  ;;  %v190_v48 = vld [vmem:[#allocation5 + $0x70] sm:$0xff]  ;;  %v220_v49 = vld [vmem:[#allocation5 + $0x160] sm:$0xff] }
  0x1a   :  { %323 = vmatpush.bf16.msra.mxu1 %v266_v33  ;;  %v265_v50 = vpack.c.bf16 %v227_v43, %v225_v42  ;;  %v222_v51 = vld [vmem:[#allocation5 + $0x170] sm:$0xff]  ;;  %v189_v52 = vld [vmem:[#allocation5 + $0x68] sm:$0xff]  ;;  %v191_v53 = vld [vmem:[#allocation5 + $0x78] sm:$0xff]  ;;  %v246_v56 = vpack.c.bf16 %v190_v48, %v188_v47 }
  0x1b   :  { %372 = vmatpush.bf16.msra.mxu2 %v251_v34  ;;  %v221_v54 = vld [vmem:[#allocation5 + $0x168] sm:$0xff]  ;;  %v223_v55 = vld [vmem:[#allocation5 + $0x178] sm:$0xff]  ;;  %v262_v57 = vpack.c.bf16 %v222_v51, %v220_v49  ;;  %v247_v58 = vpack.c.bf16 %v191_v53, %v189_v52  ;;  %v184_v59 = vld [vmem:[#allocation5 + $0x40] sm:$0xff] }
  0x1c   :  { %421 = vmatpush.bf16.msra.mxu3 %v267_v38  ;;  %v186_v60 = vld [vmem:[#allocation5 + $0x50] sm:$0xff]  ;;  %v216_v61 = vld [vmem:[#allocation5 + $0x140] sm:$0xff]  ;;  %v263_v62 = vpack.c.bf16 %v223_v55, %v221_v54  ;;  %v185_v0 = vld [vmem:[#allocation5 + $0x48] sm:$0xff] }
  0x1d   :  { %275 = vmatpush.bf16.msra.mxu0 %v248_v44  ;;  %v218_v63 = vld [vmem:[#allocation5 + $0x150] sm:$0xff]  ;;  %v187_v1 = vld [vmem:[#allocation5 + $0x58] sm:$0xff]  ;;  %v217_v2 = vld [vmem:[#allocation5 + $0x148] sm:$0xff]  ;;  %v244_v4 = vpack.c.bf16 %v186_v60, %v184_v59 }
  0x1e   :  { %324 = vmatpush.bf16.msra.mxu1 %v264_v45  ;;  %v219_v3 = vld [vmem:[#allocation5 + $0x158] sm:$0xff]  ;;  %v260_v5 = vpack.c.bf16 %v218_v63, %v216_v61  ;;  %v245_v6 = vpack.c.bf16 %v187_v1, %v185_v0  ;;  %v180_v7 = vld [vmem:[#allocation5 + $0x20] sm:$0xff]  ;;  %v182_v8 = vld [vmem:[#allocation5 + $0x30] sm:$0xff] }
  0x1f   :  { %373 = vmatpush.bf16.msra.mxu2 %v249_v46  ;;  %v212_v9 = vld [vmem:[#allocation5 + $0x120] sm:$0xff]  ;;  %v261_v10 = vpack.c.bf16 %v219_v3, %v217_v2  ;;  %v214_v11 = vld [vmem:[#allocation5 + $0x130] sm:$0xff]  ;;  %v181_v12 = vld [vmem:[#allocation5 + $0x28] sm:$0xff]  ;;  %v242_v16 = vpack.c.bf16 %v182_v8, %v180_v7 }
  0x20   :  { %422 = vmatpush.bf16.msra.mxu3 %v265_v50  ;;  %v183_v13 = vld [vmem:[#allocation5 + $0x38] sm:$0xff]  ;;  %v213_v14 = vld [vmem:[#allocation5 + $0x128] sm:$0xff]  ;;  %v258_v17 = vpack.c.bf16 %v214_v11, %v212_v9  ;;  %v176_v19 = vld [vmem:[#allocation5] sm:$0xff] }
  0x21   :  { %276 = vmatpush.bf16.msra.mxu0 %v246_v56  ;;  %v215_v15 = vld [vmem:[#allocation5 + $0x138] sm:$0xff]  ;;  %v243_v18 = vpack.c.bf16 %v183_v13, %v181_v12  ;;  %v178_v20 = vld [vmem:[#allocation5 + $0x10] sm:$0xff]  ;;  %v208_v21 = vld [vmem:[#allocation5 + $0x100] sm:$0xff] }
  0x22   :  { %325 = vmatpush.bf16.msra.mxu1 %v262_v57  ;;  %v259_v22 = vpack.c.bf16 %v215_v15, %v213_v14  ;;  %v210_v23 = vld [vmem:[#allocation5 + $0x110] sm:$0xff]  ;;  %v177_v24 = vld [vmem:[#allocation5 + $0x8] sm:$0xff]  ;;  %v179_v25 = vld [vmem:[#allocation5 + $0x18] sm:$0xff]  ;;  %v240_v28 = vpack.c.bf16 %v178_v20, %v176_v19 }
  0x23   :  { %374 = vmatpush.bf16.msra.mxu2 %v247_v58  ;;  %v209_v26 = vld [vmem:[#allocation5 + $0x108] sm:$0xff]  ;;  %v211_v27 = vld [vmem:[#allocation5 + $0x118] sm:$0xff]  ;;  %v128_v29 = vld [vmem:[#allocation2] sm:$0xff]  ;;  %v256_v31 = vpack.c.bf16 %v210_v23, %v208_v21  ;;  %v241_v32 = vpack.c.bf16 %v179_v25, %v177_v24 }
  0x24   :  { %423 = vmatpush.bf16.msra.mxu3 %v263_v62  ;;  %v130_v30 = vld [vmem:[#allocation2 + $0x10] sm:$0xff]  ;;  %v129_v33 = vld [vmem:[#allocation2 + $0x8] sm:$0xff]  ;;  %v131_v34 = vld [vmem:[#allocation2 + $0x18] sm:$0xff]  ;;  %v257_v35 = vpack.c.bf16 %v211_v27, %v209_v26 }
  0x25   :  { %277 = vmatpush.bf16.msra.mxu0 %v244_v4  ;;  %v160_v36 = vpack.c.bf16 %v130_v30, %v128_v29  ;;  %v161_v37 = vpack.c.bf16 %v131_v34, %v129_v33  ;;  %v132_v38 = vld [vmem:[#allocation2 + $0x20] sm:$0xff]  ;;  %v134_v39 = vld [vmem:[#allocation2 + $0x30] sm:$0xff]  ;;  %v133_v40 = vld [vmem:[#allocation2 + $0x28] sm:$0xff] }
  0x26   :  { %326 = vmatpush.bf16.msra.mxu1 %v260_v5  ;;  %v135_v41 = vld [vmem:[#allocation2 + $0x38] sm:$0xff]  ;;  %v162_v42 = vpack.c.bf16 %v134_v39, %v132_v38  ;;  %v136_v44 = vld [vmem:[#allocation2 + $0x40] sm:$0xff]  ;;  %v138_v45 = vld [vmem:[#allocation2 + $0x50] sm:$0xff] }
  0x27   :  { %375 = vmatpush.bf16.msra.mxu2 %v245_v6  ;;  %v163_v43 = vpack.c.bf16 %v135_v41, %v133_v40  ;;  %v137_v46 = vld [vmem:[#allocation2 + $0x48] sm:$0xff]  ;;  %v139_v47 = vld [vmem:[#allocation2 + $0x58] sm:$0xff]  ;;  %v164_v48 = vpack.c.bf16 %v138_v45, %v136_v44  ;;  %v140_v50 = vld [vmem:[#allocation2 + $0x60] sm:$0xff] }
  0x28   :  { %424 = vmatpush.bf16.msra.mxu3 %v261_v10  ;;  %v165_v49 = vpack.c.bf16 %v139_v47, %v137_v46  ;;  %v142_v51 = vld [vmem:[#allocation2 + $0x70] sm:$0xff]  ;;  %v141_v52 = vld [vmem:[#allocation2 + $0x68] sm:$0xff]  ;;  %v143_v53 = vld [vmem:[#allocation2 + $0x78] sm:$0xff] }
  0x29   :  { %278 = vmatpush.bf16.msra.mxu0 %v242_v16  ;;  %v166_v54 = vpack.c.bf16 %v142_v51, %v140_v50  ;;  %v167_v55 = vpack.c.bf16 %v143_v53, %v141_v52  ;;  %v144_v56 = vld [vmem:[#allocation2 + $0x80] sm:$0xff]  ;;  %v146_v57 = vld [vmem:[#allocation2 + $0x90] sm:$0xff]  ;;  %v145_v58 = vld [vmem:[#allocation2 + $0x88] sm:$0xff] }
  0x2a   :  { %327 = vmatpush.bf16.msra.mxu1 %v258_v17  ;;  %v147_v59 = vld [vmem:[#allocation2 + $0x98] sm:$0xff]  ;;  %v168_v60 = vpack.c.bf16 %v146_v57, %v144_v56  ;;  %v148_v62 = vld [vmem:[#allocation2 + $0xa0] sm:$0xff]  ;;  %v150_v63 = vld [vmem:[#allocation2 + $0xb0] sm:$0xff] }
  0x2b   :  { %376 = vmatpush.bf16.msra.mxu2 %v243_v18  ;;  %v169_v61 = vpack.c.bf16 %v147_v59, %v145_v58  ;;  %v149_v0 = vld [vmem:[#allocation2 + $0xa8] sm:$0xff]  ;;  %v151_v1 = vld [vmem:[#allocation2 + $0xb8] sm:$0xff]  ;;  %v170_v2 = vpack.c.bf16 %v150_v63, %v148_v62  ;;  %v152_v4 = vld [vmem:[#allocation2 + $0xc0] sm:$0xff] }
  0x2c   :  { %425 = vmatpush.bf16.msra.mxu3 %v259_v22  ;;  %v171_v3 = vpack.c.bf16 %v151_v1, %v149_v0  ;;  %v154_v5 = vld [vmem:[#allocation2 + $0xd0] sm:$0xff]  ;;  %v153_v6 = vld [vmem:[#allocation2 + $0xc8] sm:$0xff]  ;;  %v155_v7 = vld [vmem:[#allocation2 + $0xd8] sm:$0xff] }
  0x2d   :  { %279 = vmatpush.bf16.msra.mxu0 %v240_v28  ;;  %v172_v8 = vpack.c.bf16 %v154_v5, %v152_v4  ;;  %v173_v9 = vpack.c.bf16 %v155_v7, %v153_v6  ;;  %v156_v10 = vld [vmem:[#allocation2 + $0xe0] sm:$0xff]  ;;  %v158_v11 = vld [vmem:[#allocation2 + $0xf0] sm:$0xff]  ;;  %v157_v12 = vld [vmem:[#allocation2 + $0xe8] sm:$0xff] }
  0x2e   :  { %328 = vmatpush.bf16.msra.mxu1 %v256_v31  ;;  %v159_v13 = vld [vmem:[#allocation2 + $0xf8] sm:$0xff]  ;;  %v174_v14 = vpack.c.bf16 %v158_v11, %v156_v10  ;;  %v567_v16 = vld [vmem:[#allocation7] sm:$0x3] }
  0x2f   :  { %377 = vmatpush.bf16.msra.mxu2 %v241_v32  ;;  %v175_v15 = vpack.c.bf16 %v159_v13, %v157_v12  ;;  %v807_v20 = vperm.slane %v567_v16, 0  ;;  %v810_v26 = vperm.slane %v567_v16, 1 }
  0x30   :  { %426 = vmatpush.bf16.msra.mxu3 %v257_v35  ;;  %280 = vmatmul.bf16.vlgmr.msra.gmra.mxu0 %v160_v36 }
  0x31   :  { %329 = vmatmul.bf16.vlgmr.msra.gmra.mxu1 %v161_v37 }
  0x32   :  { %378 = vmatmul.bf16.vlgmr.msra.gmra.mxu2 %v160_v36 }
  0x33   :  { %427 = vmatmul.bf16.vlgmr.msra.gmra.mxu3 %v161_v37 }
  0x40   :  { %285 = vmatmul.bf16.gmra.mxu0 %v162_v42 }
  0x41   :  { %334 = vmatmul.bf16.gmra.mxu1 %v163_v43 }
  0x42   :  { %383 = vmatmul.bf16.gmra.mxu2 %v162_v42 }
  0x43   :  { %432 = vmatmul.bf16.gmra.mxu3 %v163_v43 }
  0x50   :  { %290 = vmatmul.bf16.gmra.mxu0 %v164_v48 }
  0x51   :  { %339 = vmatmul.bf16.gmra.mxu1 %v165_v49 }
  0x52   :  { %388 = vmatmul.bf16.gmra.mxu2 %v164_v48 }
  0x53   :  { %437 = vmatmul.bf16.gmra.mxu3 %v165_v49 }
  0x60   :  { %295 = vmatmul.bf16.gmra.mxu0 %v166_v54 }
  0x61   :  { %344 = vmatmul.bf16.gmra.mxu1 %v167_v55 }
  0x62   :  { %393 = vmatmul.bf16.gmra.mxu2 %v166_v54 }
  0x63   :  { %442 = vmatmul.bf16.gmra.mxu3 %v167_v55 }
  0x70   :  { %300 = vmatmul.bf16.gmra.mxu0 %v168_v60 }
  0x71   :  { %349 = vmatmul.bf16.gmra.mxu1 %v169_v61 }
  0x72   :  { %398 = vmatmul.bf16.gmra.mxu2 %v168_v60 }
  0x73   :  { %447 = vmatmul.bf16.gmra.mxu3 %v169_v61 }
  0x80   :  { %305 = vmatmul.bf16.gmra.mxu0 %v170_v2 }
  0x81   :  { %354 = vmatmul.bf16.gmra.mxu1 %v171_v3 }
  0x82   :  { %403 = vmatmul.bf16.gmra.mxu2 %v170_v2 }
  0x83   :  { %452 = vmatmul.bf16.gmra.mxu3 %v171_v3 }
  0x90   :  { %310 = vmatmul.bf16.gmra.mxu0 %v172_v8 }
  0x91   :  { %359 = vmatmul.bf16.gmra.mxu1 %v173_v9 }
  0x92   :  { %408 = vmatmul.bf16.gmra.mxu2 %v172_v8 }
  0x93   :  { %457 = vmatmul.bf16.gmra.mxu3 %v173_v9 }
  0xa0   :  { %315 = vmatmul.bf16.gmra.mxu0 %v174_v14 }
  0xa1   :  { %364 = vmatmul.bf16.gmra.mxu1 %v175_v15 }
  0xa2   :  { %413 = vmatmul.bf16.gmra.mxu2 %v174_v14 }
  0xa3   :  { %462 = vmatmul.bf16.gmra.mxu3 %v175_v15 }
  0xad   :  { %v281_v17 = vpop.f32.mrf.mxu0 }
  0xae   :  { %v330_v18 = vpop.f32.mrf.mxu1 }
  0xaf   :  { %v331_v19 = vadd.f32 %v330_v18, %v281_v17 }
  0xb1   :  { %v573_v21 = vadd.f32 %v807_v20, %v331_v19 }
  0xb3   :  { %605 = vst [vmem:[#allocation8] sm:$0xff] %v573_v21 }
  0xb5   :  { %v379_v22 = vpop.f32.mrf.mxu2  ;;  %v283_v24 = vpop.f32.mrf.mxu0 }
  0xb6   :  { %v428_v23 = vpop.f32.mrf.mxu3  ;;  %v332_v27 = vpop.f32.mrf.mxu1 }
  0xb7   :  { %v429_v25 = vadd.f32 %v428_v23, %v379_v22  ;;  %v333_v28 = vadd.f32 %v332_v27, %v283_v24 }
  0xb9   :  { %v574_v29 = vadd.f32 %v810_v26, %v429_v25  ;;  %v575_v30 = vadd.f32 %v807_v20, %v333_v28 }
  0xbb   :  { %606 = vst [vmem:[#allocation8 + $0x8] sm:$0xff] %v574_v29 }
  0xbc   :  { %607 = vst [vmem:[#allocation8 + $0x10] sm:$0xff] %v575_v30 }
  0xbd   :  { %v381_v31 = vpop.f32.mrf.mxu2  ;;  %v286_v33 = vpop.f32.mrf.mxu0 }
  0xbe   :  { %v430_v32 = vpop.f32.mrf.mxu3  ;;  %v335_v35 = vpop.f32.mrf.mxu1 }
  0xbf   :  { %v431_v34 = vadd.f32 %v430_v32, %v381_v31  ;;  %v336_v36 = vadd.f32 %v335_v35, %v286_v33 }
  0xc1   :  { %v576_v37 = vadd.f32 %v810_v26, %v431_v34  ;;  %v577_v38 = vadd.f32 %v807_v20, %v336_v36 }
  0xc3   :  { %608 = vst [vmem:[#allocation8 + $0x18] sm:$0xff] %v576_v37 }
  0xc4   :  { %609 = vst [vmem:[#allocation8 + $0x20] sm:$0xff] %v577_v38 }
  0xc5   :  { %v384_v39 = vpop.f32.mrf.mxu2  ;;  %v288_v41 = vpop.f32.mrf.mxu0 }
  0xc6   :  { %v433_v40 = vpop.f32.mrf.mxu3  ;;  %v337_v43 = vpop.f32.mrf.mxu1 }
  0xc7   :  { %v434_v42 = vadd.f32 %v433_v40, %v384_v39  ;;  %v338_v44 = vadd.f32 %v337_v43, %v288_v41 }
  0xc9   :  { %v578_v45 = vadd.f32 %v810_v26, %v434_v42  ;;  %v579_v46 = vadd.f32 %v807_v20, %v338_v44 }
  0xcb   :  { %610 = vst [vmem:[#allocation8 + $0x28] sm:$0xff] %v578_v45 }
  0xcc   :  { %611 = vst [vmem:[#allocation8 + $0x30] sm:$0xff] %v579_v46 }
  0xcd   :  { %v386_v47 = vpop.f32.mrf.mxu2  ;;  %v291_v49 = vpop.f32.mrf.mxu0 }
  0xce   :  { %v435_v48 = vpop.f32.mrf.mxu3  ;;  %v340_v51 = vpop.f32.mrf.mxu1 }
  0xcf   :  { %v436_v50 = vadd.f32 %v435_v48, %v386_v47  ;;  %v341_v52 = vadd.f32 %v340_v51, %v291_v49 }
  0xd1   :  { %v580_v53 = vadd.f32 %v810_v26, %v436_v50  ;;  %v581_v54 = vadd.f32 %v807_v20, %v341_v52 }
  0xd3   :  { %612 = vst [vmem:[#allocation8 + $0x38] sm:$0xff] %v580_v53 }
  0xd4   :  { %613 = vst [vmem:[#allocation8 + $0x40] sm:$0xff] %v581_v54 }
  0xd5   :  { %v389_v55 = vpop.f32.mrf.mxu2  ;;  %v293_v57 = vpop.f32.mrf.mxu0 }
  0xd6   :  { %v438_v56 = vpop.f32.mrf.mxu3  ;;  %v342_v59 = vpop.f32.mrf.mxu1 }
  0xd7   :  { %v439_v58 = vadd.f32 %v438_v56, %v389_v55  ;;  %v343_v60 = vadd.f32 %v342_v59, %v293_v57 }
  0xd9   :  { %v582_v61 = vadd.f32 %v810_v26, %v439_v58  ;;  %v583_v62 = vadd.f32 %v807_v20, %v343_v60 }
  0xdb   :  { %614 = vst [vmem:[#allocation8 + $0x48] sm:$0xff] %v582_v61 }
  0xdc   :  { %615 = vst [vmem:[#allocation8 + $0x50] sm:$0xff] %v583_v62 }
  0xdd   :  { %v391_v63 = vpop.f32.mrf.mxu2  ;;  %v296_v1 = vpop.f32.mrf.mxu0 }
  0xde   :  { %v440_v0 = vpop.f32.mrf.mxu3  ;;  %v345_v3 = vpop.f32.mrf.mxu1 }
  0xdf   :  { %v441_v2 = vadd.f32 %v440_v0, %v391_v63  ;;  %v346_v4 = vadd.f32 %v345_v3, %v296_v1 }
  0xe1   :  { %v584_v5 = vadd.f32 %v810_v26, %v441_v2  ;;  %v585_v6 = vadd.f32 %v807_v20, %v346_v4 }
  0xe3   :  { %616 = vst [vmem:[#allocation8 + $0x58] sm:$0xff] %v584_v5 }
  0xe4   :  { %617 = vst [vmem:[#allocation8 + $0x60] sm:$0xff] %v585_v6 }
  0xe5   :  { %v394_v7 = vpop.f32.mrf.mxu2  ;;  %v298_v9 = vpop.f32.mrf.mxu0 }
  0xe6   :  { %v443_v8 = vpop.f32.mrf.mxu3  ;;  %v347_v11 = vpop.f32.mrf.mxu1 }
  0xe7   :  { %v444_v10 = vadd.f32 %v443_v8, %v394_v7  ;;  %v348_v12 = vadd.f32 %v347_v11, %v298_v9 }
  0xe9   :  { %v586_v13 = vadd.f32 %v810_v26, %v444_v10  ;;  %v587_v14 = vadd.f32 %v807_v20, %v348_v12 }
  0xeb   :  { %618 = vst [vmem:[#allocation8 + $0x68] sm:$0xff] %v586_v13 }
  0xec   :  { %619 = vst [vmem:[#allocation8 + $0x70] sm:$0xff] %v587_v14 }
  0xed   :  { %v396_v15 = vpop.f32.mrf.mxu2  ;;  %v301_v17 = vpop.f32.mrf.mxu0 }
  0xee   :  { %v445_v16 = vpop.f32.mrf.mxu3  ;;  %v350_v19 = vpop.f32.mrf.mxu1 }
  0xef   :  { %v446_v18 = vadd.f32 %v445_v16, %v396_v15  ;;  %v351_v21 = vadd.f32 %v350_v19, %v301_v17 }
  0xf1   :  { %v588_v22 = vadd.f32 %v810_v26, %v446_v18  ;;  %v589_v23 = vadd.f32 %v807_v20, %v351_v21 }
  0xf3   :  { %620 = vst [vmem:[#allocation8 + $0x78] sm:$0xff] %v588_v22 }
  0xf4   :  { %621 = vst [vmem:[#allocation8 + $0x80] sm:$0xff] %v589_v23 }
  0xf5   :  { %v399_v24 = vpop.f32.mrf.mxu2  ;;  %v303_v27 = vpop.f32.mrf.mxu0 }
  0xf6   :  { %v448_v25 = vpop.f32.mrf.mxu3  ;;  %v352_v29 = vpop.f32.mrf.mxu1 }
  0xf7   :  { %v449_v28 = vadd.f32 %v448_v25, %v399_v24  ;;  %v353_v30 = vadd.f32 %v352_v29, %v303_v27 }
  0xf9   :  { %v590_v31 = vadd.f32 %v810_v26, %v449_v28  ;;  %v591_v32 = vadd.f32 %v807_v20, %v353_v30 }
  0xfb   :  { %622 = vst [vmem:[#allocation8 + $0x88] sm:$0xff] %v590_v31 }
  0xfc   :  { %623 = vst [vmem:[#allocation8 + $0x90] sm:$0xff] %v591_v32 }
  0xfd   :  { %v401_v33 = vpop.f32.mrf.mxu2  ;;  %v306_v35 = vpop.f32.mrf.mxu0 }
  0xfe   :  { %v450_v34 = vpop.f32.mrf.mxu3  ;;  %v355_v37 = vpop.f32.mrf.mxu1 }
  0xff   :  { %v451_v36 = vadd.f32 %v450_v34, %v401_v33  ;;  %v356_v38 = vadd.f32 %v355_v37, %v306_v35 }
 0x101   :  { %v592_v39 = vadd.f32 %v810_v26, %v451_v36  ;;  %v593_v40 = vadd.f32 %v807_v20, %v356_v38 }
 0x103   :  { %624 = vst [vmem:[#allocation8 + $0x98] sm:$0xff] %v592_v39 }
 0x104   :  { %625 = vst [vmem:[#allocation8 + $0xa0] sm:$0xff] %v593_v40 }
 0x105   :  { %v404_v41 = vpop.f32.mrf.mxu2  ;;  %v308_v43 = vpop.f32.mrf.mxu0 }
 0x106   :  { %v453_v42 = vpop.f32.mrf.mxu3  ;;  %v357_v45 = vpop.f32.mrf.mxu1 }
 0x107   :  { %v454_v44 = vadd.f32 %v453_v42, %v404_v41  ;;  %v358_v46 = vadd.f32 %v357_v45, %v308_v43 }
 0x109   :  { %v594_v47 = vadd.f32 %v810_v26, %v454_v44  ;;  %v595_v48 = vadd.f32 %v807_v20, %v358_v46 }
 0x10b   :  { %626 = vst [vmem:[#allocation8 + $0xa8] sm:$0xff] %v594_v47 }
 0x10c   :  { %627 = vst [vmem:[#allocation8 + $0xb0] sm:$0xff] %v595_v48 }
 0x10d   :  { %v406_v49 = vpop.f32.mrf.mxu2  ;;  %v311_v51 = vpop.f32.mrf.mxu0 }
 0x10e   :  { %v455_v50 = vpop.f32.mrf.mxu3  ;;  %v360_v53 = vpop.f32.mrf.mxu1 }
 0x10f   :  { %v456_v52 = vadd.f32 %v455_v50, %v406_v49  ;;  %v361_v54 = vadd.f32 %v360_v53, %v311_v51 }
 0x111   :  { %v596_v55 = vadd.f32 %v810_v26, %v456_v52  ;;  %v597_v56 = vadd.f32 %v807_v20, %v361_v54 }
 0x113   :  { %628 = vst [vmem:[#allocation8 + $0xb8] sm:$0xff] %v596_v55 }
 0x114   :  { %629 = vst [vmem:[#allocation8 + $0xc0] sm:$0xff] %v597_v56 }
 0x115   :  { %v409_v57 = vpop.f32.mrf.mxu2  ;;  %v313_v59 = vpop.f32.mrf.mxu0 }
 0x116   :  { %v458_v58 = vpop.f32.mrf.mxu3  ;;  %v362_v61 = vpop.f32.mrf.mxu1 }
 0x117   :  { %v459_v60 = vadd.f32 %v458_v58, %v409_v57  ;;  %v363_v62 = vadd.f32 %v362_v61, %v313_v59 }
 0x119   :  { %v598_v63 = vadd.f32 %v810_v26, %v459_v60  ;;  %v599_v0 = vadd.f32 %v807_v20, %v363_v62 }
 0x11b   :  { %630 = vst [vmem:[#allocation8 + $0xc8] sm:$0xff] %v598_v63 }
 0x11c   :  { %631 = vst [vmem:[#allocation8 + $0xd0] sm:$0xff] %v599_v0 }
 0x11d   :  { %v411_v1 = vpop.f32.mrf.mxu2  ;;  %v316_v3 = vpop.f32.mrf.mxu0 }
 0x11e   :  { %v460_v2 = vpop.f32.mrf.mxu3  ;;  %v365_v5 = vpop.f32.mrf.mxu1 }
 0x11f   :  { %v461_v4 = vadd.f32 %v460_v2, %v411_v1  ;;  %v366_v6 = vadd.f32 %v365_v5, %v316_v3 }
 0x121   :  { %v600_v7 = vadd.f32 %v810_v26, %v461_v4  ;;  %v601_v8 = vadd.f32 %v807_v20, %v366_v6 }
 0x123   :  { %632 = vst [vmem:[#allocation8 + $0xd8] sm:$0xff] %v600_v7 }
 0x124   :  { %633 = vst [vmem:[#allocation8 + $0xe0] sm:$0xff] %v601_v8 }
 0x125   :  { %v414_v9 = vpop.f32.mrf.mxu2  ;;  %v318_v11 = vpop.f32.mrf.mxu0 }
 0x126   :  { %v463_v10 = vpop.f32.mrf.mxu3  ;;  %v367_v13 = vpop.f32.mrf.mxu1 }
 0x127   :  { %v464_v12 = vadd.f32 %v463_v10, %v414_v9  ;;  %v368_v14 = vadd.f32 %v367_v13, %v318_v11 }
 0x129   :  { %v602_v15 = vadd.f32 %v810_v26, %v464_v12  ;;  %v603_v16 = vadd.f32 %v807_v20, %v368_v14 }
 0x12b   :  { %634 = vst [vmem:[#allocation8 + $0xe8] sm:$0xff] %v602_v15 }
 0x12c   :  { %635 = vst [vmem:[#allocation8 + $0xf0] sm:$0xff] %v603_v16 }
 0x12d   :  { %v416_v17 = vpop.f32.mrf.mxu2 }
 0x12e   :  { %v465_v18 = vpop.f32.mrf.mxu3 }
 0x12f   :  { %v466_v19 = vadd.f32 %v465_v18, %v416_v17 }
 0x131   :  { %v604_v21 = vadd.f32 %v810_v26, %v466_v19 }
 0x133   :  { %636 = vst [vmem:[#allocation8 + $0xf8] sm:$0xff] %v604_v21 }
 0x134   :  { %649 = dma.vmem_to_hbm [thread:$0]  %s642_s27, 4096, %s644_s30, [#allocation4], %s767_s20, %s767_s20, %s768_s21  }
 0x135   :  { %764 = dma.done.wait [#allocation4], 4096  }
 0x136   :  { %765 = vsyncadd [#allocation4], 4294963200 }
 0x137   :  { %654 = vsyncpa [#allocation3], 1 }
 0x138   :  { %655 = vsyncpa [#allocation6], 1 }
 0x139   :  { %656 = vsyncpa [#allocation4], 1 }

</bundles_post_ra>
